<compile_context>
chip_gen: v7x
topology: tpu7x:2x2x1
jax: 0.10.0
libtpu: 0.0.40
codegen_flags: <defaults>
</compile_context>

<pallas_src>
import functools

import jax
import jax.numpy as jnp
from jax.experimental import pallas as pl
from jax.experimental.pallas import tpu as pltpu

_LANE = 128


def _pow2_at_least(v):
    d = 1
    while d < v:
        d *= 2
    return d


def _arb_loss_kernel(n_true, n_pad, d_groups,
                     x_ref, mean_ref, lbd_ref, outk_ref, w_ref, theta_ref,
                     o_ref):
    """One superblock (D*P instances) per grid step.

    x_ref     : (D*Np, 128)  packed parameter rows
    mean_ref  : (D, 128)     per-(group, lane) mean
    lbd_ref   : (D*Np, D*Np) block-diagonal Laplacian kron(I_D, L)  (resident)
    outk_ref  : (D*Np, 128)  packed recon targets (zeros on unknown rows)
    w_ref     : (D*Np, 128)  eta * known-row mask, packed
    theta_ref : (D, 128)     per-(group, lane) theta
    o_ref     : (D, 128)     per-(group, lane) partial loss (lane-dense)
    """
    d, npd = d_groups, n_pad

    x3 = x_ref[...].reshape(d, npd, _LANE)
    xn3 = x3 - mean_ref[...][:, None, :]                     # normalize
    if n_pad != n_true:
        # Zero the zero-padded rows so they don't pollute the avg-term sums
        # (unused in the demo where N already divides 128).
        rowv = (jax.lax.broadcasted_iota(jnp.int32, (1, npd, _LANE), 1)
                < n_true).astype(xn3.dtype)
        xn3 = xn3 * rowv

    # Single full-depth MXU matmul: block-diag(L) @ xn == per-group L @ xn.
    xn = xn3.reshape(d * npd, _LANE)
    lx3 = jnp.dot(lbd_ref[...], xn,
                  preferred_element_type=jnp.float32).reshape(d, npd, _LANE)

    diff3 = xn3 - outk_ref[...].reshape(d, npd, _LANE)
    w3 = w_ref[...].reshape(d, npd, _LANE)

    # dirichlet + eta*recon fused; reduce the rows of each group (sublane sum).
    fused = xn3 * lx3 + w3 * (diff3 * diff3)
    part = jnp.sum(fused, axis=1)                            # (D, 128)

    # avg_L term eliminated algebraically (uses the true node count).
    inv_nm1 = 1.0 / (n_true - 1.0)
    c_diag = n_true * inv_nm1
    sq = jnp.sum(xn3 * xn3, axis=1)                          # (D, 128)
    col = jnp.sum(xn3, axis=1)                               # (D, 128)
    avg_part = c_diag * sq - inv_nm1 * (col * col)

    o_ref[...] = -(part + theta_ref[...] * avg_part)


def pack_arb_loss_problem(mean, L, out_k_full, know_mask_f, eta, theta):
    """Pack the init-time constants of arbLoss for the batched kernel.

    mean        : (B, 1, F)   per-instance attribute mean over known rows
    L           : (N, N)      shared sym-normalized Laplacian (one graph)
    out_k_full  : (B, N, F)   out_k_init scattered into full rows, 0 elsewhere
    know_mask_f : (B, N, 1)   1.0 on known rows
    eta, theta  : (B,)        per-instance coefficients
    """
    b, n, f = out_k_full.shape
    assert n >= 2, "arbLoss needs >= 2 nodes (avg_L divides by N-1)"
    assert n <= _LANE and f <= _LANE, (
        "TODO(synk): use the row-tiled large-N variant for N or F > 128")

    wl = _pow2_at_least(f)            # lanes per instance (divides 128)
    n_pad = _pow2_at_least(n)         # rows per instance  (divides 128)
    p = _LANE // wl                   # instances per lane group
    d = _LANE // n_pad                # lane groups per superblock
    per_sb = p * d                    # instances per superblock / grid step
    s = -(-b // per_sb)               # number of superblocks (= grid length)
    b_pad = s * per_sb
    f32 = jnp.float32

    def pad_inst(a):                  # pad instance axis with zero instances
        return jnp.pad(a, ((0, b_pad - b),) + ((0, 0),) * (a.ndim - 1))

    def pack_rows(a):                 # (b_pad, n, f) -> (s, d*n_pad, p*wl)
        a = jnp.pad(a, ((0, 0), (0, n_pad - n), (0, wl - f)))
        a = a.reshape(s, d, p, n_pad, wl)
        a = jnp.transpose(a, (0, 1, 3, 2, 4))
        return a.reshape(s, d * n_pad, p * wl)

    def pack_lane(a):                 # (b_pad, wl) -> (s, d, p*wl)
        return a.reshape(s, d, p * wl)

    mean2 = jnp.pad(pad_inst(mean.astype(f32)).reshape(b_pad, f),
                    ((0, 0), (0, wl - f)))
    mean_p = pack_lane(mean2)
    outk_p = pack_rows(pad_inst(out_k_full.astype(f32)))
    w_full = pad_inst(eta.astype(f32)[:, None, None]
                      * know_mask_f.astype(f32)
                      * jnp.ones((1, 1, f), f32))             # (b_pad, n, f)
    w_p = pack_rows(w_full)
    theta_p = pack_lane(jnp.repeat(pad_inst(theta.astype(f32))[:, None],
                                   wl, axis=1))
    l_pad = jnp.zeros((n_pad, n_pad), f32).at[:n, :n].set(L.astype(f32))
    lbd = jnp.kron(jnp.eye(d, dtype=f32), l_pad)              # (128, 128)

    consts = dict(mean=mean_p, outk=outk_p, w=w_p, theta=theta_p, lbd=lbd)
    dims = dict(b=b, n=n, f=f, wl=wl, n_pad=n_pad, p=p, d=d, s=s)
    return consts, dims


def make_arb_loss_forward(consts, dims):
    """Returns a jitted forward: x (B, N, F) -> per-instance losses (B,)."""
    b, n, f = dims["b"], dims["n"], dims["f"]
    wl, n_pad, p, d, s = (dims["wl"], dims["n_pad"], dims["p"],
                          dims["d"], dims["s"])
    b_pad = s * d * p
    rb = d * n_pad                                            # rows / superblock

    kernel = functools.partial(_arb_loss_kernel, n, n_pad, d)

    grid_spec = pltpu.PrefetchScalarGridSpec(
        num_scalar_prefetch=0,
        grid=(s,),                                            # keep s>=2 for v7x
        in_specs=[
            pl.BlockSpec((None, rb, _LANE), lambda i: (i, 0, 0)),   # x
            pl.BlockSpec((None, d, _LANE),  lambda i: (i, 0, 0)),   # mean
            pl.BlockSpec((rb, rb),          lambda i: (0, 0)),      # L_bd resident
            pl.BlockSpec((None, rb, _LANE), lambda i: (i, 0, 0)),   # out_k
            pl.BlockSpec((None, rb, _LANE), lambda i: (i, 0, 0)),   # eta*mask
            pl.BlockSpec((None, d, _LANE),  lambda i: (i, 0, 0)),   # theta
        ],
        out_specs=pl.BlockSpec((None, d, _LANE), lambda i: (i, 0, 0)),
    )

    call = pl.pallas_call(
        kernel,
        out_shape=jax.ShapeDtypeStruct((s, d, _LANE), jnp.float32),
        grid_spec=grid_spec,
        compiler_params=pltpu.CompilerParams(
            dimension_semantics=("parallel",)),
    )

    mean_p, outk_p = consts["mean"], consts["outk"]
    w_p, theta_p, lbd = consts["w"], consts["theta"], consts["lbd"]

    @jax.jit
    def forward(x):
        # Only the parameter x is (re)packed per call; constants packed once.
        xp = x.astype(jnp.float32)
        xp = jnp.pad(xp, ((0, b_pad - b), (0, n_pad - n), (0, wl - f)))
        xp = xp.reshape(s, d, p, n_pad, wl)
        xp = jnp.transpose(xp, (0, 1, 3, 2, 4)).reshape(s, rb, _LANE)

        out = call(xp, mean_p, lbd, outk_p, w_p, theta_p)     # (s, d, 128)
        # per-instance loss = sum of that instance's wl lanes
        return out.reshape(s, d, p, wl).sum(axis=-1).reshape(b_pad)[:b]

    return forward


def arb_loss_forward(x, mean, L, out_k_full, know_mask_f, eta, theta):
    """Single-instance forward, matching arbLoss.forward()/get_loss()."""
    consts, dims = pack_arb_loss_problem(
        mean[None], L, out_k_full[None], know_mask_f[None],
        jnp.asarray([eta], jnp.float32), jnp.asarray([theta], jnp.float32))
    return make_arb_loss_forward(consts, dims)(x[None])[0]


if __name__ == "__main__":
    key = jax.random.PRNGKey(0)
    B, N, F = 256, 16, 8                                   # 2 superblocks -> grid=(2,)

    kx, kk, ka, kb, kp = jax.random.split(key, 5)
    raw_x = jax.random.normal(kx, (B, N, F), jnp.float32)
    num_known = jax.random.randint(kk, (B,), 2, N)            # per-instance known rows
    row_mask = (jnp.arange(N)[None, :] < num_known[:, None]).astype(jnp.float32)
    know_mask_f = row_mask[:, :, None]                        # (B, N, 1)

    mean = (jnp.sum(raw_x * know_mask_f, axis=1, keepdims=True)
            / num_known[:, None, None].astype(jnp.float32))   # (B, 1, F)
    out_k_full = (raw_x - mean) * know_mask_f                 # (B, N, F), std = 1

    alpha = jax.random.uniform(ka, (B,), jnp.float32, 0.1, 0.9)
    beta = jax.random.uniform(kb, (B,), jnp.float32, 0.1, 0.9)
    theta = (1.0 - 1.0 / N) * (1.0 / alpha - 1.0)
    eta = (1.0 / beta - 1.0) / alpha

    # Shared ring-graph Laplacian (sym-normalized), as get_laplacian would build.
    idx = jnp.arange(N)
    adj = jnp.zeros((N, N), jnp.float32)
    adj = adj.at[idx, (idx + 1) % N].set(1.0)
    adj = adj.at[(idx + 1) % N, idx].set(1.0)
    deg = adj.sum(axis=1)
    dis = jnp.where(deg > 0, 1.0 / jnp.sqrt(deg), 0.0)
    L = jnp.eye(N, dtype=jnp.float32) - dis[:, None] * adj * dis[None, :]

    # Parameter x a few "optimizer steps" away from init so every term is nonzero.
    x = raw_x * know_mask_f + 0.1 * jax.random.normal(kp, (B, N, F), jnp.float32)

    consts, dims = pack_arb_loss_problem(mean, L, out_k_full, know_mask_f,
                                         eta, theta)
    forward = make_arb_loss_forward(consts, dims)
    losses = jax.block_until_ready(forward(x))

    # Pure-JAX reference (dense avg_L exactly as the PyTorch module builds it).
    avg_L = (N / (N - 1)) * jnp.eye(N, dtype=jnp.float32) \
        - (1.0 / (N - 1)) * jnp.ones((N, N), jnp.float32)
    xn = x - mean
    dirichlet = jnp.sum(xn * jnp.einsum("ij,bjf->bif", L, xn), axis=(1, 2))
    avg = jnp.sum(xn * jnp.einsum("ij,bjf->bif", avg_L, xn), axis=(1, 2))
    recon = jnp.sum(know_mask_f * (xn - out_k_full) ** 2, axis=(1, 2))
    refs = -(dirichlet + eta * recon + theta * avg)

    assert losses.shape == (B,)
    assert jnp.allclose(losses, refs, rtol=1e-4, atol=1e-2), (
        losses[:4], refs[:4], float(jnp.max(jnp.abs(losses - refs))))

    # Single-instance path (matches the original module's forward()).
    single = jax.block_until_ready(
        arb_loss_forward(x[0], mean[0], L, out_k_full[0], know_mask_f[0],
                         float(eta[0]), float(theta[0])))
    assert jnp.allclose(single, refs[0], rtol=1e-4, atol=1e-2), (single, refs[0])

    print("KERNEL_OK")
</pallas_src>

<mosaic_0001>
module attributes {stable_mosaic.version = 11 : i64} {
  func.func @_arb_loss_kernel(%arg0: i32, %arg1: memref<1x128x128xf32, #tpu.memory_space<vmem>>, %arg2: memref<1x8x128xf32, #tpu.memory_space<vmem>>, %arg3: memref<128x128xf32, #tpu.memory_space<vmem>>, %arg4: memref<1x128x128xf32, #tpu.memory_space<vmem>>, %arg5: memref<1x128x128xf32, #tpu.memory_space<vmem>>, %arg6: memref<1x8x128xf32, #tpu.memory_space<vmem>>, %arg7: memref<1x8x128xf32, #tpu.memory_space<vmem>>) attributes {dimension_semantics = [#tpu.dimension_semantics<parallel>], iteration_bounds = array<i64: 2>, scalar_prefetch = 0 : i64, scratch_operands = 0 : i64, tpu.core_type = #tpu.core_type<tc>, window_params = [{transform_indices = @transform_0, window_bounds = array<i64: 1, 128, 128>}, {transform_indices = @transform_1, window_bounds = array<i64: 1, 8, 128>}, {pipeline_mode = #tpu.pipeline_mode<synchronous>, transform_indices = @transform_2, window_bounds = array<i64: 128, 128>}, {transform_indices = @transform_3, window_bounds = array<i64: 1, 128, 128>}, {transform_indices = @transform_4, window_bounds = array<i64: 1, 128, 128>}, {transform_indices = @transform_5, window_bounds = array<i64: 1, 8, 128>}, {transform_indices = @transform_6, window_bounds = array<i64: 1, 8, 128>}]} {
    %c0 = arith.constant 0 : index
    %c0_0 = arith.constant 0 : index
    %c0_1 = arith.constant 0 : index
    %0 = vector.load %arg1[%c0, %c0_0, %c0_1] : memref<1x128x128xf32, #tpu.memory_space<vmem>>, vector<1x128x128xf32>
    %1 = vector.shape_cast %0 : vector<1x128x128xf32> to vector<128x128xf32>
    %2 = vector.shape_cast %1 : vector<128x128xf32> to vector<8x16x128xf32>
    %c0_2 = arith.constant 0 : index
    %c0_3 = arith.constant 0 : index
    %c0_4 = arith.constant 0 : index
    %3 = vector.load %arg2[%c0_2, %c0_3, %c0_4] : memref<1x8x128xf32, #tpu.memory_space<vmem>>, vector<1x8x128xf32>
    %4 = vector.shape_cast %3 : vector<1x8x128xf32> to vector<8x128xf32>
    %5 = vector.shape_cast %4 : vector<8x128xf32> to vector<8x1x128xf32>
    %6 = vector.broadcast %5 : vector<8x1x128xf32> to vector<8x16x128xf32>
    %7 = arith.subf %2, %6 : vector<8x16x128xf32>
    %8 = vector.shape_cast %7 : vector<8x16x128xf32> to vector<128x128xf32>
    %c0_5 = arith.constant 0 : index
    %c0_6 = arith.constant 0 : index
    %9 = vector.load %arg3[%c0_5, %c0_6] : memref<128x128xf32, #tpu.memory_space<vmem>>, vector<128x128xf32>
    %cst = arith.constant dense<0.000000e+00> : vector<128x128xf32>
    %10 = tpu.matmul %9, %8, %cst {dimension_numbers = #tpu.dot_dimension_numbers<[1], [0], [0], [1], [0, 0, 1, 1], [], []>} : vector<128x128xf32>, vector<128x128xf32>, vector<128x128xf32> -> vector<128x128xf32>
    %11 = vector.shape_cast %10 : vector<128x128xf32> to vector<8x16x128xf32>
    %c0_7 = arith.constant 0 : index
    %c0_8 = arith.constant 0 : index
    %c0_9 = arith.constant 0 : index
    %12 = vector.load %arg4[%c0_7, %c0_8, %c0_9] : memref<1x128x128xf32, #tpu.memory_space<vmem>>, vector<1x128x128xf32>
    %13 = vector.shape_cast %12 : vector<1x128x128xf32> to vector<128x128xf32>
    %14 = vector.shape_cast %13 : vector<128x128xf32> to vector<8x16x128xf32>
    %15 = arith.subf %7, %14 : vector<8x16x128xf32>
    %c0_10 = arith.constant 0 : index
    %c0_11 = arith.constant 0 : index
    %c0_12 = arith.constant 0 : index
    %16 = vector.load %arg5[%c0_10, %c0_11, %c0_12] : memref<1x128x128xf32, #tpu.memory_space<vmem>>, vector<1x128x128xf32>
    %17 = vector.shape_cast %16 : vector<1x128x128xf32> to vector<128x128xf32>
    %18 = vector.shape_cast %17 : vector<128x128xf32> to vector<8x16x128xf32>
    %19 = arith.mulf %7, %11 : vector<8x16x128xf32>
    %20 = arith.mulf %15, %15 : vector<8x16x128xf32>
    %21 = arith.mulf %18, %20 : vector<8x16x128xf32>
    %22 = arith.addf %19, %21 : vector<8x16x128xf32>
    %cst_13 = arith.constant dense<0.000000e+00> : vector<8x128xf32>
    %23 = vector.multi_reduction <add>, %22, %cst_13 [1] : vector<8x16x128xf32> to vector<8x128xf32>
    %24 = arith.mulf %7, %7 : vector<8x16x128xf32>
    %cst_14 = arith.constant dense<0.000000e+00> : vector<8x128xf32>
    %25 = vector.multi_reduction <add>, %24, %cst_14 [1] : vector<8x16x128xf32> to vector<8x128xf32>
    %cst_15 = arith.constant dense<0.000000e+00> : vector<8x128xf32>
    %26 = vector.multi_reduction <add>, %7, %cst_15 [1] : vector<8x16x128xf32> to vector<8x128xf32>
    %cst_16 = arith.constant 1.06666672 : f32
    %27 = vector.broadcast %cst_16 : f32 to vector<8x128xf32>
    %28 = arith.mulf %27, %25 : vector<8x128xf32>
    %29 = arith.mulf %26, %26 : vector<8x128xf32>
    %cst_17 = arith.constant 0.0666666701 : f32
    %30 = vector.broadcast %cst_17 : f32 to vector<8x128xf32>
    %31 = arith.mulf %30, %29 : vector<8x128xf32>
    %32 = arith.subf %28, %31 : vector<8x128xf32>
    %c0_18 = arith.constant 0 : index
    %c0_19 = arith.constant 0 : index
    %c0_20 = arith.constant 0 : index
    %33 = vector.load %arg6[%c0_18, %c0_19, %c0_20] : memref<1x8x128xf32, #tpu.memory_space<vmem>>, vector<1x8x128xf32>
    %34 = vector.shape_cast %33 : vector<1x8x128xf32> to vector<8x128xf32>
    %35 = arith.mulf %34, %32 : vector<8x128xf32>
    %36 = arith.addf %23, %35 : vector<8x128xf32>
    %cst_21 = arith.constant 0.000000e+00 : f32
    %37 = vector.broadcast %cst_21 : f32 to vector<8x128xf32>
    %38 = arith.subf %37, %36 : vector<8x128xf32>
    %c0_22 = arith.constant 0 : index
    %c0_23 = arith.constant 0 : index
    %c0_24 = arith.constant 0 : index
    %39 = vector.load %arg7[%c0_22, %c0_23, %c0_24] : memref<1x8x128xf32, #tpu.memory_space<vmem>>, vector<1x8x128xf32>
    %40 = vector.shape_cast %39 : vector<1x8x128xf32> to vector<8x128xf32>
    %41 = vector.shape_cast %38 : vector<8x128xf32> to vector<1x8x128xf32>
    tpu.vector_store %arg7[%c0_22, %c0_23, %c0_24], %41 {strides = array<i32>} : memref<1x8x128xf32, #tpu.memory_space<vmem>>, vector<1x8x128xf32>,
    return
  }
  func.func @transform_0(%arg0: i32) -> (i32, i32, i32) {
    %c0_i32 = arith.constant 0 : i32
    %c0_i32_0 = arith.constant 0 : i32
    %c0_i32_1 = arith.constant 0 : i32
    return %arg0, %c0_i32, %c0_i32_0 : i32, i32, i32
  }
  func.func @transform_1(%arg0: i32) -> (i32, i32, i32) {
    %c0_i32 = arith.constant 0 : i32
    %c0_i32_0 = arith.constant 0 : i32
    %c0_i32_1 = arith.constant 0 : i32
    return %arg0, %c0_i32, %c0_i32_0 : i32, i32, i32
  }
  func.func @transform_2(%arg0: i32) -> (i32, i32) {
    %c0_i32 = arith.constant 0 : i32
    %c0_i32_0 = arith.constant 0 : i32
    %c0_i32_1 = arith.constant 0 : i32
    return %c0_i32, %c0_i32_0 : i32, i32
  }
  func.func @transform_3(%arg0: i32) -> (i32, i32, i32) {
    %c0_i32 = arith.constant 0 : i32
    %c0_i32_0 = arith.constant 0 : i32
    %c0_i32_1 = arith.constant 0 : i32
    return %arg0, %c0_i32, %c0_i32_0 : i32, i32, i32
  }
  func.func @transform_4(%arg0: i32) -> (i32, i32, i32) {
    %c0_i32 = arith.constant 0 : i32
    %c0_i32_0 = arith.constant 0 : i32
    %c0_i32_1 = arith.constant 0 : i32
    return %arg0, %c0_i32, %c0_i32_0 : i32, i32, i32
  }
  func.func @transform_5(%arg0: i32) -> (i32, i32, i32) {
    %c0_i32 = arith.constant 0 : i32
    %c0_i32_0 = arith.constant 0 : i32
    %c0_i32_1 = arith.constant 0 : i32
    return %arg0, %c0_i32, %c0_i32_0 : i32, i32, i32
  }
  func.func @transform_6(%arg0: i32) -> (i32, i32, i32) {
    %c0_i32 = arith.constant 0 : i32
    %c0_i32_0 = arith.constant 0 : i32
    %c0_i32_1 = arith.constant 0 : i32
    return %arg0, %c0_i32, %c0_i32_0 : i32, i32, i32
  }
}

</mosaic_0001>

<bundles_post_ra>
// kernel: forward.1
= control target key start
LH: loop header
LB: loop body
LE: loop exit
PB: predicated region body
PF: predicated region fallthrough
CT: control target
= control target key end

     0   :  { %s1327_s21 = smov 0   ;;  %s1636_s0 = inlined_call_operand.vmem [shape: f32[2,128,128], index: 0, kind: input, shape index: {}]   ;;  %s1637_s1 = inlined_call_operand.vmem [shape: f32[2,8,128], index: 1, kind: input, shape index: {}]   ;;  %s1638_s2 = inlined_call_operand.vmem [shape: f32[128,128], index: 2, kind: input, shape index: {}]   ;;  %s1639_s3 = inlined_call_operand.vmem [shape: f32[2,128,128], index: 3, kind: input, shape index: {}]   ;;  %s1640_s4 = inlined_call_operand.vmem [shape: f32[2,128,128], index: 4, kind: input, shape index: {}]   ;;  %s1641_s5 = inlined_call_operand.vmem [shape: f32[2,8,128], index: 5, kind: input, shape index: {}]   ;;  %s1642_s6 = inlined_call_operand.vmem [shape: f32[2,8,128], index: 6, kind: output, shape index: {}]  }
   0x1 LB: > { %s1118_s22 = sadd.s32 4294967295, %s1289_s21   ;;  %p1122_p0 = scmp.ge.s32.totalorder %s1289_s21, 1  ;;  %s1289_s21 = sphi %s1327_s21, %s16_s21  }
   0x2   : > { %p250_p1 = scmp.lt.s32.totalorder %s1289_s21, 3 }
   0x4   : > { %p251_p2 = pnand %p1122_p0, %p250_p1 }
   0x5   : > { %p297_p3 = scmp.lt.s32.totalorder (!%p251_p2), %s1118_s22, 1  ;;  %v346_v0 = vlaneseq (!%p251_p2)  ;;  %v447_v1 = vld [vmem:[%s1638_s2] sm:$0xff] (!%p251_p2)  ;;  %v1291_v2 = vmov (!%p251_p2), 1966171168   ;;  %vm945_vm0 = vcmask (!%p251_p2), 1041409   ;;  %vm947_vm1 = vcmask (!%p251_p2), 1042434  }
   0x6   : > { %254 = sbr.rel (%p251_p2) target bundleno = 315 (0x13b), region = 44  ;;  %v344_v3 = vunpack.c.l.s4 (!%p251_p2), %v1291_v2  ;;  %1201 = vmatprep.mubr.f32.mxu0 (!%p251_p2), %v447_v1  ;;  %v455_v4 = vld [vmem:[%s1638_s2 + $0x40] sm:$0xff] (!%p251_p2)  ;;  %vm949_vm2 = vcmask (!%p251_p2), 1043459   ;;  %vm951_vm3 = vcmask (!%p251_p2), 1044484   ;;  %vm953_vm4 = vcmask (!%p251_p2), 1045509  }
   0x7   : > { %v347_v5 = vshrl.u32 (!%p251_p2), %v346_v0, 7  ;;  %1213 = vmatprep.mubr.f32.mxu1 (!%p251_p2), %v455_v4  ;;  %vm955_vm5 = vcmask (!%p251_p2), 1046534   ;;  %vm957_vm6 = vcmask (!%p251_p2), 1047559  }
   0x8   : > { %v345_v6 = vunpack.c.0.s8 (!%p251_p2), %v344_v3 }
   0x9   : > { %v1355_v10 = vsub.s32 (!%p251_p2), 0, %v347_v5 }
   0xa   : > { %v348_v7 = vsub.s32 (!%p251_p2), %v345_v6, %v347_v5 }
   0xd   : > { %s1644_s22 = smov (!%p297_p3, %s1118_s22), 1 }
   0xe   : > { %s1341_s27 = sshll.u32 %s1644_s22, 7  ;;  %s1343_s28 = sshll.u32 %s1644_s22, 3 }
   0xf   : > { %s305_s7 = scalar_lea.vmem %s1637_s1, %s1343_s28  ;;  %s1353_s10 = scalar_lea.vmem %s1636_s0, %s1341_s27 }
  0x10   : > { %v340_v8 = vld [vmem:[%s305_s7] sm:$0xff]  ;;  %v325_v14 = vld [vmem:[%s1353_s10 + $0x8] sm:$0xff]  ;;  %v326_v18 = vld [vmem:[%s1353_s10 + $0x10] sm:$0xff]  ;;  %s1525_s20 = scalar_lea.vmem %s1639_s3, %s1341_s27  ;;  %s1547_s24 = scalar_lea.vmem %s1640_s4, %s1341_s27 }
  0x11   : > { %v349_v9 = vrot.slane %v340_v8, %v348_v7  ;;  %v324_v13 = vld [vmem:[%s1353_s10] sm:$0xff]  ;;  %v327_v21 = vld [vmem:[%s1353_s10 + $0x18] sm:$0xff]  ;;  %v329_v24 = vld [vmem:[%s1353_s10 + $0x28] sm:$0xff]  ;;  %v342_v28 = vcombine.high %v340_v8, %v340_v8  ;;  %s319_s26 = scalar_lea.vmem %s1641_s5, %s1343_s28  ;;  %s323_s7 = scalar_lea.vmem %s1642_s6, %s1343_s28 }
  0x12   : > { %v328_v23 = vld [vmem:[%s1353_s10 + $0x20] sm:$0xff]  ;;  %v330_v36 = vld [vmem:[%s1353_s10 + $0x30] sm:$0xff]  ;;  %v331_v37 = vld [vmem:[%s1353_s10 + $0x38] sm:$0xff] }
  0x13   : > { %v365_v11 = vrot.slane %v349_v9, %v348_v7  ;;  %v357_v12 = vcombine.high %v349_v9, %v349_v9  ;;  %v356_v38 = vrot.slane %v342_v28, %v348_v7  ;;  %v332_v44 = vld [vmem:[%s1353_s10 + $0x40] sm:$0xff]  ;;  %v333_v46 = vld [vmem:[%s1353_s10 + $0x48] sm:$0xff]  ;;  %v334_v52 = vld [vmem:[%s1353_s10 + $0x50] sm:$0xff] }
  0x14   : > { %v335_v53 = vld [vmem:[%s1353_s10 + $0x58] sm:$0xff]  ;;  %v336_v55 = vld [vmem:[%s1353_s10 + $0x60] sm:$0xff]  ;;  %v337_v59 = vld [vmem:[%s1353_s10 + $0x68] sm:$0xff] }
  0x15   : > { %v394_v15 = vrot.slane %v365_v11, %v1355_v10  ;;  %v379_v16 = vrot.slane %v357_v12, %v348_v7  ;;  %v387_v17 = vcombine.high %v365_v11, %v365_v11  ;;  %v372_v41 = vrot.slane %v356_v38, %v348_v7  ;;  %v338_v1 = vld [vmem:[%s1353_s10 + $0x70] sm:$0xff]  ;;  %v339_v2 = vld [vmem:[%s1353_s10 + $0x78] sm:$0xff]  ;;  %v456_v8 = vld [vmem:[%s1638_s2 + $0x48] sm:$0xff] }
  0x16   : > { %v358_v45 = vcombine.high %v356_v38, %v356_v38  ;;  %v449_v9 = vld [vmem:[%s1638_s2 + $0x10] sm:$0xff]  ;;  %v450_v11 = vld [vmem:[%s1638_s2 + $0x18] sm:$0xff] }
  0x17   : > { %v1361_v19 = vsub.f32 %v324_v13, %v394_v15  ;;  %v1363_v20 = vsub.f32 %v325_v14, %v394_v15  ;;  %v398_v22 = vrot.slane %v379_v16, %v1355_v10  ;;  %v402_v25 = vrot.slane %v387_v17, %v1355_v10  ;;  %v458_v12 = vld [vmem:[%s1638_s2 + $0x58] sm:$0xff]  ;;  %v451_v13 = vld [vmem:[%s1638_s2 + $0x20] sm:$0xff]  ;;  %v452_v15 = vld [vmem:[%s1638_s2 + $0x28] sm:$0xff] }
  0x18   : > { %v389_v26 = vcombine.high %v379_v16, %v379_v16  ;;  %v410_v43 = vrot.slane %v372_v41, %v1355_v10  ;;  %v386_v49 = vrot.slane %v358_v45, %v348_v7  ;;  %v388_v50 = vcombine.high %v372_v41, %v372_v41  ;;  %v448_v7 = vld [vmem:[%s1638_s2 + $0x8] sm:$0xff]  ;;  %v459_v14 = vld [vmem:[%s1638_s2 + $0x60] sm:$0xff]  ;;  %v453_v17 = vld [vmem:[%s1638_s2 + $0x30] sm:$0xff] }
  0x19   : > { %v1225_v27 = vpack.c.bf16 %v1363_v20, %v1361_v19  ;;  %v1372_v29 = vsub.f32 %v326_v18, %v398_v22  ;;  %v1374_v30 = vsub.f32 %v327_v21, %v398_v22  ;;  %v1376_v31 = vsub.f32 %v328_v23, %v402_v25  ;;  %v460_v16 = vld [vmem:[%s1638_s2 + $0x68] sm:$0xff]  ;;  %v461_v18 = vld [vmem:[%s1638_s2 + $0x70] sm:$0xff]  ;;  %v454_v21 = vld [vmem:[%s1638_s2 + $0x38] sm:$0xff] }
  0x1a   : > { %v1378_v32 = vsub.f32 %v329_v24, %v402_v25  ;;  %v406_v34 = vrot.slane %v389_v26, %v1355_v10  ;;  %v1396_v47 = vsub.f32 %v332_v44, %v410_v43  ;;  %v1398_v48 = vsub.f32 %v333_v46, %v410_v43  ;;  %v462_v22 = vld [vmem:[%s1638_s2 + $0x78] sm:$0xff] }
  0x1b   : > { %1226 = vmatprep.subr.bf16.mxu0 %v1225_v27  ;;  %1257 = vmatprep.subr.bf16.mxu1 %v1225_v27  ;;  %v1229_v33 = vpack.c.bf16 %v1374_v30, %v1372_v29  ;;  %v414_v54 = vrot.slane %v386_v49, %v1355_v10  ;;  %v418_v56 = vrot.slane %v388_v50, %v1355_v10 }
  0x1c   : > { %1228 = vmatpush3.bf16.msra.mxu0 %v1225_v27  ;;  %1265 = vmatpush3.bf16.msra.mxu1 %v1225_v27  ;;  %v1233_v35 = vpack.c.bf16 %v1378_v32, %v1376_v31  ;;  %v1387_v39 = vsub.f32 %v330_v36, %v406_v34  ;;  %v1389_v40 = vsub.f32 %v331_v37, %v406_v34 }
  0x1d   : > { %1230 = vmatprep.subr.bf16.mxu0 %v1229_v33  ;;  %1258 = vmatprep.subr.bf16.mxu1 %v1229_v33  ;;  %v1241_v51 = vpack.c.bf16 %v1398_v48, %v1396_v47  ;;  %v1407_v57 = vsub.f32 %v334_v52, %v414_v54  ;;  %v1409_v58 = vsub.f32 %v335_v53, %v414_v54 }
  0x1e   : > { %v1237_v42 = vpack.c.bf16 %v1389_v40, %v1387_v39  ;;  %v1412_v60 = vsub.f32 %v336_v55, %v418_v56  ;;  %v1416_v62 = vsub.f32 %v337_v59, %v418_v56  ;;  %v390_v63 = vcombine.high %v386_v49, %v386_v49 }
  0x1f   : > { %v1245_v61 = vpack.c.bf16 %v1409_v58, %v1407_v57  ;;  %v776_v23 = vmul.f32 %v1361_v19, %v1361_v19  ;;  %v777_v24 = vmul.f32 %v1363_v20, %v1363_v20  ;;  %v848_v25 = vadd.f32 %v1363_v20, %v1361_v19 }
  0x20   : > { %1232 = vmatpush3.bf16.msra.mxu0 %v1229_v33  ;;  %1266 = vmatpush3.bf16.msra.mxu1 %v1229_v33  ;;  %v1249_v0 = vpack.c.bf16 %v1416_v62, %v1412_v60  ;;  %v422_v3 = vrot.slane %v390_v63, %v1355_v10  ;;  %v457_v10 = vld [vmem:[%s1638_s2 + $0x50] sm:$0xff]  ;;  %v778_v26 = vmul.f32 %v1372_v29, %v1372_v29 }
  0x21   : > { %1234 = vmatprep.subr.bf16.mxu0 %v1233_v35  ;;  %1259 = vmatprep.subr.bf16.mxu1 %v1233_v35  ;;  %v779_v27 = vmul.f32 %v1374_v30, %v1374_v30  ;;  %v855_v28 = vadd.f32 %v1374_v30, %v1372_v29  ;;  %v792_v33 = vadd.f32 %v777_v24, %v776_v23  ;;  %v849_v34 = vrot.slane %v848_v25, 4 }
  0x22   : > { %v1423_v4 = vsub.f32 %v338_v1, %v422_v3  ;;  %v1425_v5 = vsub.f32 %v339_v2, %v422_v3  ;;  %v780_v36 = vmul.f32 %v1376_v31, %v1376_v31  ;;  %v781_v37 = vmul.f32 %v1378_v32, %v1378_v32 }
  0x23   : > { %v856_v38 = vrot.slane %v855_v28, 4  ;;  %v862_v41 = vadd.f32 %v1378_v32, %v1376_v31  ;;  %v783_v43 = vmul.f32 %v1389_v40, %v1389_v40  ;;  %v793_v44 = vrot.slane %v792_v33, 4 }
  0x24   : > { %1236 = vmatpush3.bf16.msra.mxu0 %v1233_v35  ;;  %1267 = vmatpush3.bf16.msra.mxu1 %v1233_v35  ;;  %v1253_v6 = vpack.c.bf16 %v1425_v5, %v1423_v4  ;;  %v799_v35 = vadd.f32 %v779_v27, %v778_v26  ;;  %v850_v45 = vadd.f32 %v849_v34, %v848_v25 }
  0x25   : > { %1238 = vmatprep.subr.bf16.mxu0 %v1237_v42  ;;  %1260 = vmatprep.subr.bf16.mxu1 %v1237_v42  ;;  %v869_v49 = vadd.f32 %v1389_v40, %v1387_v39  ;;  %v857_v50 = vadd.f32 %v856_v38, %v855_v28  ;;  %v863_v52 = vrot.slane %v862_v41, 4  ;;  %v784_v54 = vmul.f32 %v1396_v47, %v1396_v47 }
  0x26   : > { %v800_v46 = vrot.slane %v799_v35, 4  ;;  %v785_v55 = vmul.f32 %v1398_v48, %v1398_v48  ;;  %v876_v56 = vadd.f32 %v1398_v48, %v1396_v47  ;;  %v794_v59 = vadd.f32 %v793_v44, %v792_v33 }
  0x27   : > { %v858_v1 = vrot.slane %v857_v50, 2  ;;  %v864_v3 = vadd.f32 %v863_v52, %v862_v41  ;;  %v788_v26 = vmul.f32 %v1412_v60, %v1412_v60  ;;  %v789_v27 = vmul.f32 %v1416_v62, %v1416_v62 }
  0x28   : > { %1240 = vmatpush3.bf16.msra.mxu0 %v1237_v42  ;;  %1268 = vmatpush3.bf16.msra.mxu1 %v1237_v42  ;;  %v782_v42 = vmul.f32 %v1387_v39, %v1387_v39  ;;  %v801_v63 = vadd.f32 %v800_v46, %v799_v35  ;;  %v890_v28 = vadd.f32 %v1416_v62, %v1412_v60 }
  0x29   : > { %1242 = vmatprep.subr.bf16.mxu0 %v1241_v51  ;;  %1261 = vmatprep.subr.bf16.mxu1 %v1241_v51  ;;  %v790_v52 = vmul.f32 %v1423_v4, %v1423_v4 }
  0x2a   : > { %v813_v53 = vadd.f32 %v783_v43, %v782_v42 }
  0x2c   : > { %1244 = vmatpush3.bf16.msra.mxu0 %v1241_v51  ;;  %1269 = vmatpush3.bf16.msra.mxu1 %v1241_v51  ;;  %v806_v51 = vadd.f32 %v781_v37, %v780_v36 }
  0x2d   : > { %1246 = vmatprep.subr.bf16.mxu0 %v1245_v61  ;;  %1262 = vmatprep.subr.bf16.mxu1 %v1245_v61 }
  0x2e   : > { %v807_v2 = vrot.slane %v806_v51, 4 }
  0x30   : > { %1248 = vmatpush3.bf16.msra.mxu0 %v1245_v61  ;;  %1270 = vmatpush3.bf16.msra.mxu1 %v1245_v61  ;;  %v851_v61 = vrot.slane %v850_v45, 2 }
  0x31   : > { %1250 = vmatprep.subr.bf16.mxu0 %v1249_v0  ;;  %1263 = vmatprep.subr.bf16.mxu1 %v1249_v0 }
  0x34   : > { %1252 = vmatpush3.bf16.msra.mxu0 %v1249_v0  ;;  %1271 = vmatpush3.bf16.msra.mxu1 %v1249_v0  ;;  %v870_v0 = vrot.slane %v869_v49, 4 }
  0x35   : > { %1254 = vmatprep.subr.bf16.mxu0 %v1253_v6  ;;  %1264 = vmatprep.subr.bf16.mxu1 %v1253_v6 }
  0x38   : > { %1256 = vmatpush3.bf16.msra.mxu0 %v1253_v6  ;;  %1272 = vmatpush3.bf16.msra.mxu1 %v1253_v6  ;;  %v814_v6 = vrot.slane %v813_v53, 4 }
  0x3b   : > { %1202 = vmatmul.mubr.f32.vlgmr.msra.gmra.mrb[0].mxu0 %v448_v7  ;;  %1214 = vmatmul.mubr.f32.vlgmr.msra.gmra.mrb[0].mxu1 %v456_v8  ;;  %v820_v7 = vadd.f32 %v785_v55, %v784_v54  ;;  %v786_v8 = vmul.f32 %v1407_v57, %v1407_v57  ;;  %v897_v54 = vadd.f32 %v1425_v5, %v1423_v4 }
  0x3c   : > { %1204 = vmatprep.mubr.f32.mxu0 %v449_v9  ;;  %1216 = vmatprep.mubr.f32.mxu1 %v457_v10  ;;  %v787_v9 = vmul.f32 %v1409_v58, %v1409_v58  ;;  %v883_v10 = vadd.f32 %v1409_v58, %v1407_v57 }
  0x3e   : > { %v827_v23 = vadd.f32 %v787_v9, %v786_v8  ;;  %v884_v24 = vrot.slane %v883_v10, 4 }
  0x3f   : > { %1205 = vmatmul.mubr.f32.gmra.mrb[2].mxu0 %v450_v11  ;;  %1217 = vmatmul.mubr.f32.gmra.mrb[2].mxu1 %v458_v12  ;;  %v877_v11 = vrot.slane %v876_v56, 4  ;;  %v795_v12 = vrot.slane %v794_v59, 2 }
  0x40   : > { %1207 = vmatprep.mubr.f32.mxu0 %v451_v13  ;;  %1219 = vmatprep.mubr.f32.mxu1 %v459_v14  ;;  %v852_v13 = vadd.f32 %v851_v61, %v850_v45  ;;  %v871_v14 = vadd.f32 %v870_v0, %v869_v49  ;;  %v828_v43 = vrot.slane %v827_v23, 4  ;;  %v885_v44 = vadd.f32 %v884_v24, %v883_v10 }
  0x41   : > { %v878_v25 = vadd.f32 %v877_v11, %v876_v56  ;;  %v796_v33 = vadd.f32 %v795_v12, %v794_v59  ;;  %v834_v49 = vadd.f32 %v789_v27, %v788_v26  ;;  %v898_v12 = vrot.slane %v897_v54, 4 }
  0x42   : > { %v872_v34 = vrot.slane %v871_v14, 2  ;;  %v853_v35 = vrot.slane %v852_v13, 1 }
  0x43   : > { %1208 = vmatmul.mubr.f32.gmra.mrb[4].mxu0 %v452_v15  ;;  %1220 = vmatmul.mubr.f32.gmra.mrb[4].mxu1 %v460_v16  ;;  %v802_v15 = vrot.slane %v801_v63, 2  ;;  %v859_v16 = vadd.f32 %v858_v1, %v857_v50  ;;  %v879_v46 = vrot.slane %v878_v25, 2  ;;  %v891_v50 = vrot.slane %v890_v28, 4 }
  0x44   : > { %1210 = vmatprep.mubr.f32.mxu0 %v453_v17  ;;  %1222 = vmatprep.mubr.f32.mxu1 %v461_v18  ;;  %v808_v17 = vadd.f32 %v807_v2, %v806_v51  ;;  %v865_v18 = vrot.slane %v864_v3, 2  ;;  %v873_v51 = vadd.f32 %v872_v34, %v871_v14  ;;  %v797_v55 = vrot.slane %v796_v33, 1 }
  0x45   : > { %v803_v36 = vadd.f32 %v802_v15, %v801_v63  ;;  %v860_v41 = vrot.slane %v859_v16, 1  ;;  %v854_v56 = vadd.f32 %v853_v35, %v852_v13  ;;  %v829_v1 = vadd.f32 %v828_v43, %v827_v23 }
  0x46   : > { %v809_v37 = vrot.slane %v808_v17, 2  ;;  %v866_v38 = vadd.f32 %v865_v18, %v864_v3  ;;  %v886_v2 = vrot.slane %v885_v44, 2  ;;  %v892_v8 = vadd.f32 %v891_v50, %v890_v28 }
  0x47   : > { %1211 = vmatmul.mubr.f32.gmra.mrb[6].mxu0 %v454_v21  ;;  %1223 = vmatmul.mubr.f32.gmra.mrb[6].mxu1 %v462_v22  ;;  %v815_v21 = vadd.f32 %v814_v6, %v813_v53  ;;  %v821_v22 = vrot.slane %v820_v7, 4  ;;  %v791_v53 = vmul.f32 %v1425_v5, %v1425_v5  ;;  %v804_v63 = vrot.slane %v803_v36, 1 }
  0x48   : > { %v810_v59 = vadd.f32 %v809_v37, %v808_v17  ;;  %v867_v61 = vrot.slane %v866_v38, 1  ;;  %v861_v0 = vadd.f32 %v860_v41, %v859_v16  ;;  %v880_v6 = vadd.f32 %v879_v46, %v878_v25 }
  0x49   : > { %v816_v42 = vrot.slane %v815_v21, 2  ;;  %v822_v45 = vadd.f32 %v821_v22, %v820_v7  ;;  %v835_v7 = vrot.slane %v834_v49, 4  ;;  %v874_v10 = vrot.slane %v873_v51, 1 }
  0x4a   : > { %v841_v11 = vadd.f32 %v791_v53, %v790_v52  ;;  %v798_v14 = vadd.f32 %v797_v55, %v796_v33  ;;  %v912_v15 = vmul.f32 %v854_v56, %v854_v56  ;;  %v811_v18 = vrot.slane %v810_v59, 1 }
  0x4b   : > { %v823_v3 = vrot.slane %v822_v45, 2  ;;  %v817_v9 = vadd.f32 %v816_v42, %v815_v21  ;;  %v868_v22 = vadd.f32 %v867_v61, %v866_v38  ;;  %v805_v24 = vadd.f32 %v804_v63, %v803_v36 }
  0x4c   : > { %v913_v13 = vmul.f32 %v861_v0, %v861_v0  ;;  %v830_v17 = vrot.slane %v829_v1, 2  ;;  %v887_v26 = vadd.f32 %v886_v2, %v885_v44  ;;  %v881_v16 = vrot.slane %v880_v6, 1 }
  0x4d   : > { %v824_v27 = vadd.f32 %v823_v3, %v822_v45  ;;  %v836_v23 = vadd.f32 %v835_v7, %v834_v49  ;;  %v893_v34 = vrot.slane %v892_v8, 2  ;;  %v818_v35 = vrot.slane %v817_v9, 1 }
  0x4e   : > { %v875_v25 = vadd.f32 %v874_v10, %v873_v51  ;;  %v842_v37 = vrot.slane %v841_v11, 4  ;;  %v899_v28 = vadd.f32 %v898_v12, %v897_v54  ;;  %v904_v21 = vmul.f32 1.0666667, %v798_v14 }
  0x4f   : > { %v920_v41 = vmul.f32 0.06666667, %v912_v15  ;;  %v812_v42 = vadd.f32 %v811_v18, %v810_v59  ;;  %v914_v43 = vmul.f32 %v868_v22, %v868_v22  ;;  %v905_v33 = vmul.f32 1.0666667, %v805_v24 }
  0x50   : > { %v921_v46 = vmul.f32 0.06666667, %v913_v13  ;;  %v831_v50 = vadd.f32 %v830_v17, %v829_v1  ;;  %v888_v38 = vrot.slane %v887_v26, 1  ;;  %v825_v36 = vrot.slane %v824_v27, 1 }
  0x51   : > { %v882_v52 = vadd.f32 %v881_v16, %v880_v6  ;;  %v837_v53 = vrot.slane %v836_v23, 2  ;;  %v894_v44 = vadd.f32 %v893_v34, %v892_v8  ;;  %v819_v45 = vadd.f32 %v818_v35, %v817_v9 }
  0x52   : > { %v915_v55 = vmul.f32 %v875_v25, %v875_v25  ;;  %v843_v49 = vadd.f32 %v842_v37, %v841_v11  ;;  %v900_v56 = vrot.slane %v899_v28, 2  ;;  %v906_v51 = vmul.f32 1.0666667, %v812_v42  ;;  %v609_v42 = vld [vmem:[%s1525_s20 + $0x8] sm:$0xff] }
  0x53   : > { %v922_v61 = vmul.f32 0.06666667, %v914_v43  ;;  %v928_v54 = vsub.f32 %v904_v21, %v920_v41  ;;  %v929_v63 = vsub.f32 %v905_v33, %v921_v46  ;;  %v832_v0 = vrot.slane %v831_v50, 1  ;;  %v617_v33 = vld [vmem:[%s1525_s20 + $0x48] sm:$0xff]  ;;  %v608_v46 = vld [vmem:[%s1525_s20] sm:$0xff] }
  0x54   : > { %v889_v59 = vadd.f32 %v888_v38, %v887_v26  ;;  %v826_v2 = vadd.f32 %v825_v36, %v824_v27  ;;  %v916_v3 = vmul.f32 %v882_v52, %v882_v52  ;;  %v838_v7 = vadd.f32 %v837_v53, %v836_v23  ;;  %v611_v53 = vld [vmem:[%s1525_s20 + $0x18] sm:$0xff] }
  0x55   : > { %v895_v1 = vrot.slane %v894_v44, 1  ;;  %v907_v10 = vmul.f32 1.0666667, %v819_v45  ;;  %v923_v12 = vmul.f32 0.06666667, %v915_v55  ;;  %v844_v6 = vrot.slane %v843_v49, 2 }
  0x56   : > { %v901_v8 = vadd.f32 %v900_v56, %v899_v28  ;;  %v930_v9 = vsub.f32 %v906_v51, %v922_v61  ;;  %v946_v11 = vsel %vm945_vm0, %v929_v63, %v928_v54  ;;  %v833_v14 = vadd.f32 %v832_v0, %v831_v50  ;;  %v616_v50 = vld [vmem:[%s1525_s20 + $0x40] sm:$0xff]  ;;  %v610_v56 = vld [vmem:[%s1525_s20 + $0x10] sm:$0xff]  ;;  %v613_v61 = vld [vmem:[%s1525_s20 + $0x28] sm:$0xff] }
  0x57   : > { %v917_v15 = vmul.f32 %v889_v59, %v889_v59  ;;  %v908_v18 = vmul.f32 1.0666667, %v826_v2  ;;  %v924_v22 = vmul.f32 0.06666667, %v916_v3  ;;  %v839_v24 = vrot.slane %v838_v7, 1  ;;  %v618_v51 = vld [vmem:[%s1525_s20 + $0x50] sm:$0xff] }
  0x58   : > { %v896_v13 = vadd.f32 %v895_v1, %v894_v44  ;;  %v931_v17 = vsub.f32 %v907_v10, %v923_v12  ;;  %v845_v26 = vadd.f32 %v844_v6, %v843_v49  ;;  %v902_v27 = vrot.slane %v901_v8, 1  ;;  %v619_v44 = vld [vmem:[%s1525_s20 + $0x58] sm:$0xff]  ;;  %v621_v59 = vld [vmem:[%s1525_s20 + $0x68] sm:$0xff]  ;;  %v612_v1 = vld [vmem:[%s1525_s20 + $0x20] sm:$0xff] }
  0x59   : > { %v948_v16 = vsel %vm947_vm1, %v930_v9, %v946_v11  ;;  %v909_v23 = vmul.f32 1.0666667, %v833_v14  ;;  %v925_v34 = vmul.f32 0.06666667, %v917_v15  ;;  %v932_v35 = vsub.f32 %v908_v18, %v924_v22  ;;  %v620_v18 = vld [vmem:[%s1525_s20 + $0x60] sm:$0xff]  ;;  %v641_v22 = vld [vmem:[%s1547_s24 + $0x8] sm:$0xff] }
  0x5a   : > { %v840_v25 = vadd.f32 %v839_v24, %v838_v7  ;;  %v918_v37 = vmul.f32 %v896_v13, %v896_v13  ;;  %v950_v28 = vsel %vm949_vm2, %v931_v17, %v948_v16  ;;  %v846_v21 = vrot.slane %v845_v26, 1  ;;  %v649_v24 = vld [vmem:[%s1547_s24 + $0x48] sm:$0xff]  ;;  %v640_v16 = vld [vmem:[%s1547_s24] sm:$0xff] }
  0x5b   : > { %v903_v41 = vadd.f32 %v902_v27, %v901_v8  ;;  %v933_v43 = vsub.f32 %v909_v23, %v925_v34  ;;  %v952_v38 = vsel %vm951_vm3, %v932_v35, %v950_v28  ;;  %v625_v49 = vsub.f32 %v1363_v20, %v609_v42  ;;  %v648_v23 = vld [vmem:[%s1547_s24 + $0x40] sm:$0xff]  ;;  %v643_v34 = vld [vmem:[%s1547_s24 + $0x18] sm:$0xff] }
  0x5c   : > { %v910_v36 = vmul.f32 1.0666667, %v840_v25  ;;  %v926_v52 = vmul.f32 0.06666667, %v918_v37  ;;  %v847_v45 = vadd.f32 %v846_v21, %v845_v26  ;;  %v633_v54 = vsub.f32 %v1398_v48, %v617_v33  ;;  %v651_v37 = vld [vmem:[%s1547_s24 + $0x58] sm:$0xff] }
  0x5d   : > { %v919_v55 = vmul.f32 %v903_v41, %v903_v41  ;;  %v624_v63 = vsub.f32 %v1361_v19, %v608_v46  ;;  %v632_v0 = vsub.f32 %v1396_v47, %v616_v50  ;;  %v954_v2 = vsel %vm953_vm4, %v933_v43, %v952_v38  ;;  %v615_v43 = vld [vmem:[%s1525_s20 + $0x38] sm:$0xff] }
  0x5e   : > { %v627_v3 = vsub.f32 %v1374_v30, %v611_v53  ;;  %v635_v7 = vsub.f32 %v1409_v58, %v619_v44  ;;  %v934_v10 = vsub.f32 %v910_v36, %v926_v52  ;;  %v626_v12 = vsub.f32 %v1372_v29, %v610_v56  ;;  %v623_v33 = vld [vmem:[%s1525_s20 + $0x78] sm:$0xff]  ;;  %v642_v36 = vld [vmem:[%s1547_s24 + $0x10] sm:$0xff]  ;;  %v645_v53 = vld [vmem:[%s1547_s24 + $0x28] sm:$0xff] }
  0x5f   : > { %v634_v6 = vsub.f32 %v1407_v57, %v618_v51  ;;  %v629_v8 = vsub.f32 %v1378_v32, %v613_v61  ;;  %v1556_v9 = vmul.f32 1.0666667, %v847_v45  ;;  %v1558_v11 = vmul.f32 0.06666667, %v919_v55  ;;  %v650_v52 = vld [vmem:[%s1547_s24 + $0x50] sm:$0xff]  ;;  %v653_v56 = vld [vmem:[%s1547_s24 + $0x68] sm:$0xff] }
  0x60   : > { %v673_v14 = vmul.f32 %v625_v49, %v625_v49  ;;  %v637_v15 = vsub.f32 %v1416_v62, %v621_v59  ;;  %v681_v13 = vmul.f32 %v633_v54, %v633_v54  ;;  %v672_v17 = vmul.f32 %v624_v63, %v624_v63  ;;  %v614_v61 = vld [vmem:[%s1525_s20 + $0x30] sm:$0xff] }
  0x61   : > { %v680_v26 = vmul.f32 %v632_v0, %v632_v0  ;;  %v628_v27 = vsub.f32 %v1376_v31, %v612_v1  ;;  %v675_v35 = vmul.f32 %v627_v3, %v627_v3  ;;  %v683_v25 = vmul.f32 %v635_v7, %v635_v7  ;;  %v644_v0 = vld [vmem:[%s1547_s24 + $0x20] sm:$0xff] }
  0x62   : > { %v674_v28 = vmul.f32 %v626_v12, %v626_v12  ;;  %v682_v21 = vmul.f32 %v634_v6, %v634_v6  ;;  %v677_v41 = vmul.f32 %v629_v8, %v629_v8  ;;  %v636_v42 = vsub.f32 %v1412_v60, %v620_v18  ;;  %v652_v18 = vld [vmem:[%s1547_s24 + $0x60] sm:$0xff] }
  0x63   : > { %v956_v46 = vsel %vm955_vm5, %v934_v10, %v954_v2  ;;  %v935_v50 = vsub.f32 %v1556_v9, %v1558_v11  ;;  %v689_v38 = vmul.f32 %v673_v14, %v641_v22  ;;  %v685_v44 = vmul.f32 %v637_v15, %v637_v15 }
  0x64   : > { %v697_v45 = vmul.f32 %v681_v13, %v649_v24  ;;  %v688_v55 = vmul.f32 %v672_v17, %v640_v16  ;;  %v696_v49 = vmul.f32 %v680_v26, %v648_v23  ;;  %v676_v51 = vmul.f32 %v628_v27, %v628_v27  ;;  %v622_v24 = vld [vmem:[%s1525_s20 + $0x70] sm:$0xff] }
  0x65   : > { %v691_v54 = vmul.f32 %v675_v35, %v643_v34  ;;  %v699_v63 = vmul.f32 %v683_v25, %v651_v37  ;;  %v631_v59 = vsub.f32 %v1389_v40, %v615_v43  ;;  %v639_v2 = vsub.f32 %v1425_v5, %v623_v33 }
  0x66   : > { %v690_v1 = vmul.f32 %v674_v28, %v642_v36  ;;  %v698_v10 = vmul.f32 %v682_v21, %v650_v52  ;;  %v693_v12 = vmul.f32 %v677_v41, %v645_v53  ;;  %v684_v6 = vmul.f32 %v636_v42, %v636_v42  ;;  %v647_v28 = vld [vmem:[%s1547_s24 + $0x38] sm:$0xff]  ;;  %v936_v36 = vld [vmem:[%s319_s26] sm:$0xff] }
  0x67   : > { %v701_v15 = vmul.f32 %v685_v44, %v653_v56  ;;  %v630_v22 = vsub.f32 %v1387_v39, %v614_v61  ;;  %v692_v26 = vmul.f32 %v676_v51, %v644_v0  ;;  %v679_v27 = vmul.f32 %v631_v59, %v631_v59  ;;  %v655_v21 = vld [vmem:[%s1547_s24 + $0x78] sm:$0xff]  ;;  %v646_v61 = vld [vmem:[%s1547_s24 + $0x30] sm:$0xff] }
  0x68   : > { %v687_v16 = vmul.f32 %v639_v2, %v639_v2  ;;  %v700_v37 = vmul.f32 %v684_v6, %v652_v18  ;;  %v654_v18 = vld [vmem:[%s1547_s24 + $0x70] sm:$0xff] }
  0x69   : > { %v695_v56 = vmul.f32 %v679_v27, %v647_v28 }
  0x6a   : > { %v703_v51 = vmul.f32 %v687_v16, %v655_v21 }
 0x10e   : > { %v1203_v3 = vpop.f32.mrb[0].mxu0  ;;  %v1215_v7 = vpop.f32.mrb[0].mxu1 }
 0x10f   : > { %v657_v8 = vmul.f32 %v1203_v3, %v1363_v20  ;;  %v665_v9 = vmul.f32 %v1215_v7, %v1398_v48  ;;  %v529_v11 = vpop.f32.mrb[1].mxu0  ;;  %v569_v14 = vpop.f32.mrb[1].mxu1 }
 0x110   : > { %v656_v13 = vmul.f32 %v529_v11, %v1361_v19  ;;  %v664_v17 = vmul.f32 %v569_v14, %v1396_v47  ;;  %v638_v19 = vsub.f32 %v1423_v4, %v622_v24  ;;  %v958_v47 = vsel %vm957_vm6, %v935_v50, %v956_v46 }
 0x111   : > { %v705_v20 = vadd.f32 %v689_v38, %v657_v8  ;;  %v713_v48 = vadd.f32 %v697_v45, %v665_v9  ;;  %v678_v38 = vmul.f32 %v630_v22, %v630_v22  ;;  %v1603_v2 = vmul.f32 %v958_v47, %v936_v36 }
 0x112   : > { %v704_v23 = vadd.f32 %v688_v55, %v656_v13  ;;  %v712_v34 = vadd.f32 %v696_v49, %v664_v17  ;;  %v1206_v35 = vpop.f32.mrb[2].mxu0  ;;  %v1218_v25 = vpop.f32.mrb[2].mxu1 }
 0x113   : > { %v659_v41 = vmul.f32 %v1206_v35, %v1374_v30  ;;  %v667_v42 = vmul.f32 %v1218_v25, %v1409_v58  ;;  %v539_v43 = vpop.f32.mrb[3].mxu0  ;;  %v579_v33 = vpop.f32.mrb[3].mxu1  ;;  %v694_v9 = vmul.f32 %v678_v38, %v646_v61 }
 0x114   : > { %v720_v52 = vadd.f32 %v705_v20, %v704_v23  ;;  %v748_v53 = vadd.f32 %v713_v48, %v712_v34  ;;  %v658_v44 = vmul.f32 %v539_v43, %v1372_v29  ;;  %v666_v45 = vmul.f32 %v579_v33, %v1407_v57 }
 0x115   : > { %v707_v55 = vadd.f32 %v691_v54, %v659_v41  ;;  %v715_v49 = vadd.f32 %v699_v63, %v667_v42  ;;  %v686_v54 = vmul.f32 %v638_v19, %v638_v19  ;;  %v962_v33 = vrot.slane %v1603_v2, 1 }
 0x116   : > { %v721_v46 = vrot.slane %v720_v52, 4  ;;  %v749_v50 = vrot.slane %v748_v53, 4  ;;  %v706_v30 = vadd.f32 %v690_v1, %v658_v44  ;;  %v714_v0 = vadd.f32 %v698_v10, %v666_v45  ;;  %v1209_v58 = vpop.f32.mrb[4].mxu0  ;;  %v1221_v59 = vpop.f32.mrb[4].mxu1 }
 0x117   : > { %v661_v3 = vmul.f32 %v1209_v58, %v1378_v32  ;;  %v669_v29 = vmul.f32 %v1221_v59, %v1416_v62  ;;  %v549_v7 = vpop.f32.mrb[5].mxu0  ;;  %v589_v57 = vpop.f32.mrb[5].mxu1  ;;  %v702_v35 = vmul.f32 %v686_v54, %v654_v18 }
 0x118   : > { %v722_v63 = vadd.f32 %v721_v46, %v720_v52  ;;  %v727_v6 = vadd.f32 %v707_v55, %v706_v30  ;;  %v755_v8 = vadd.f32 %v715_v49, %v714_v0  ;;  %v660_v1 = vmul.f32 %v549_v7, %v1376_v31 }
 0x119   : > { %v709_v11 = vadd.f32 %v693_v12, %v661_v3  ;;  %v717_v14 = vadd.f32 %v701_v15, %v669_v29  ;;  %v668_v10 = vmul.f32 %v589_v57, %v1412_v60  ;;  %v750_v24 = vadd.f32 %v749_v50, %v748_v53 }
 0x11a   : > { %v723_v22 = vrot.slane %v722_v63, 2  ;;  %v728_v13 = vrot.slane %v727_v6, 4  ;;  %v756_v32 = vrot.slane %v755_v8, 4  ;;  %v1212_v17 = vpop.f32.mrb[6].mxu0  ;;  %v1224_v62 = vpop.f32.mrb[6].mxu1  ;;  %v708_v20 = vadd.f32 %v692_v26, %v660_v1 }
 0x11b   : > { %v716_v48 = vadd.f32 %v700_v37, %v668_v10  ;;  %v663_v27 = vmul.f32 %v1212_v17, %v1389_v40  ;;  %v671_v16 = vmul.f32 %v1224_v62, %v1425_v5  ;;  %v559_v23 = vpop.f32.mrb[7].mxu0  ;;  %v599_v12 = vpop.f32.mrb[7].mxu1  ;;  %v751_v47 = vrot.slane %v750_v24, 2 }
 0x11c   : > { %v724_v15 = vadd.f32 %v723_v22, %v722_v63  ;;  %v729_v34 = vadd.f32 %v728_v13, %v727_v6  ;;  %v757_v31 = vadd.f32 %v756_v32, %v755_v8  ;;  %v734_v60 = vadd.f32 %v709_v11, %v708_v20 }
 0x11d   : > { %v762_v25 = vadd.f32 %v717_v14, %v716_v48  ;;  %v711_v28 = vadd.f32 %v695_v56, %v663_v27  ;;  %v719_v21 = vadd.f32 %v703_v51, %v671_v16  ;;  %v662_v40 = vmul.f32 %v559_v23, %v1387_v39 }
 0x11e   : > { %v725_v19 = vrot.slane %v724_v15, 1  ;;  %v730_v41 = vrot.slane %v729_v34, 2  ;;  %v758_v42 = vrot.slane %v757_v31, 2  ;;  %v735_v26 = vrot.slane %v734_v60, 4 }
 0x11f   : > { %v763_v37 = vrot.slane %v762_v25, 4  ;;  %v670_v5 = vmul.f32 %v599_v12, %v1423_v4  ;;  %v710_v52 = vadd.f32 %v694_v9, %v662_v40  ;;  %v752_v45 = vadd.f32 %v751_v47, %v750_v24 }
 0x120   : > { %v731_v43 = vadd.f32 %v730_v41, %v729_v34  ;;  %v736_v38 = vadd.f32 %v735_v26, %v734_v60  ;;  %v726_v44 = vadd.f32 %v725_v19, %v724_v15  ;;  %v759_v49 = vadd.f32 %v758_v42, %v757_v31 }
 0x121   : > { %v764_v36 = vadd.f32 %v763_v37, %v762_v25  ;;  %v718_v53 = vadd.f32 %v702_v35, %v670_v5  ;;  %v741_v61 = vadd.f32 %v711_v28, %v710_v52  ;;  %v753_v59 = vrot.slane %v752_v45, 1 }
 0x122   : > { %v732_v55 = vrot.slane %v731_v43, 1  ;;  %v737_v56 = vrot.slane %v736_v38, 2  ;;  %v977_v58 = vadd.f32 %v1603_v2, %v726_v44  ;;  %v963_v29 = vrot.slane %v1603_v2, 2 }
 0x123   : > { %v765_v51 = vrot.slane %v764_v36, 2  ;;  %v769_v46 = vadd.f32 %v719_v21, %v718_v53  ;;  %v742_v0 = vrot.slane %v741_v61, 4  ;;  %v760_v7 = vrot.slane %v759_v49, 1 }
 0x124   : > { %v733_v50 = vadd.f32 %v732_v55, %v731_v43  ;;  %v738_v30 = vadd.f32 %v737_v56, %v736_v38  ;;  %v965_v9 = vrot.slane %v1603_v2, 4  ;;  %v985_v10 = vsub.f32 0.0, %v977_v58 }
 0x125   : > { %v766_v39 = vadd.f32 %v765_v51, %v764_v36  ;;  %v770_v4 = vrot.slane %v769_v46, 4  ;;  %v743_v54 = vadd.f32 %v742_v0, %v741_v61  ;;  %v754_v18 = vadd.f32 %v753_v59, %v752_v45 }
 0x126   : > { %v978_v3 = vadd.f32 %v962_v33, %v733_v50  ;;  %v739_v57 = vrot.slane %v738_v30, 1  ;;  %v966_v24 = vrot.slane %v1603_v2, 5  ;;  %v761_v13 = vadd.f32 %v760_v7, %v759_v49 }
 0x127   : > { %v771_v63 = vadd.f32 %v770_v4, %v769_v46  ;;  %v767_v8 = vrot.slane %v766_v39, 1  ;;  %v744_v14 = vrot.slane %v743_v54, 2  ;;  %v967_v27 = vrot.slane %v1603_v2, 6 }
 0x128   : > { %v986_v6 = vsub.f32 0.0, %v978_v3  ;;  %v740_v11 = vadd.f32 %v739_v57, %v738_v30  ;;  %v964_v16 = vrot.slane %v1603_v2, 3  ;;  %v968_v34 = vrot.slane %v1603_v2, 7 }
 0x129   : > { %v772_v1 = vrot.slane %v771_v63, 2  ;;  %v745_v17 = vadd.f32 %v744_v14, %v743_v54  ;;  %v768_v48 = vadd.f32 %v767_v8, %v766_v39  ;;  %v981_v31 = vadd.f32 %v965_v9, %v754_v18 }
 0x12a   : > { %v1001_v22 = vrot.slane %v986_v6, 7  ;;  %v979_v32 = vadd.f32 %v963_v29, %v740_v11  ;;  %v982_v35 = vadd.f32 %v966_v24, %v761_v13 }
 0x12b   : > { %v773_v62 = vadd.f32 %v772_v1, %v771_v63  ;;  %v746_v12 = vrot.slane %v745_v17, 1  ;;  %v983_v21 = vadd.f32 %v967_v27, %v768_v48  ;;  %v989_v42 = vsub.f32 0.0, %v981_v31 }
 0x12c   : > { %v1002_v20 = vsel %vm945_vm0, %v1001_v22, %v985_v10  ;;  %v987_v23 = vsub.f32 0.0, %v979_v32  ;;  %v990_v26 = vsub.f32 0.0, %v982_v35 }
 0x12d   : > { %v774_v15 = vrot.slane %v773_v62, 1  ;;  %v747_v25 = vadd.f32 %v746_v12, %v745_v17  ;;  %v991_v40 = vsub.f32 0.0, %v983_v21  ;;  %v1007_v33 = vrot.slane %v989_v42, 4 }
 0x12e   : > { %v1003_v60 = vrot.slane %v987_v23, 6  ;;  %v1009_v38 = vrot.slane %v990_v26, 3 }
 0x12f   : > { %v775_v28 = vadd.f32 %v774_v15, %v773_v62  ;;  %v980_v47 = vadd.f32 %v964_v16, %v747_v25  ;;  %v1011_v36 = vrot.slane %v991_v40, 2 }
 0x130   : > { %v1004_v19 = vsel %vm947_vm1, %v1003_v60, %v1002_v20 }
 0x131   : > { %v984_v41 = vadd.f32 %v968_v34, %v775_v28  ;;  %v988_v37 = vsub.f32 0.0, %v980_v47 }
 0x133   : > { %v1005_v5 = vrot.slane %v988_v37, 5  ;;  %v992_v43 = vsub.f32 0.0, %v984_v41 }
 0x135   : > { %v1006_v2 = vsel %vm949_vm2, %v1005_v5, %v1004_v19  ;;  %v1013_v44 = vrot.slane %v992_v43, 1 }
 0x136   : > { %v1008_v52 = vsel %vm951_vm3, %v1007_v33, %v1006_v2 }
 0x137   : > { %v1010_v53 = vsel %vm953_vm4, %v1009_v38, %v1008_v52 }
 0x138   : > { %v1012_v45 = vsel %vm955_vm5, %v1011_v36, %v1010_v53 }
 0x139   : > { %v1014_v55 = vsel %vm957_vm6, %v1013_v44, %v1012_v45 }
 0x13a   : > { %1016 = vst [vmem:[%s323_s7] sm:$0xff] %v1014_v55 }
 0x13b PF: > { %s16_s21 = sadd.s32 1, %s1289_s21  }
 0x13c   : > { %p13_p4 = scmp.ge.s32.totalorder %s16_s21, 4  }
 0x13e   :  { %15 = sbr.rel (!%p13_p4) target bundleno = 1 (0x1), region = 86 }

</bundles_post_ra>
